<compile_context>
chip_gen: v7x
topology: tpu7x:2x2x1
jax: 0.10.0
libtpu: 0.0.40
codegen_flags: <defaults>
</compile_context>

<pallas_src>
import jax
import jax.numpy as jnp
from jax.experimental import pallas as pl
from jax.experimental.pallas import tpu as pltpu


def potential_kernel(s_ref, g_ref,
                     w1s_ref, w1g_ref, b1_ref,
                     w2_ref, b2_ref,
                     w3_ref, b3_ref,
                     o_ref):
    # l1: concat([s, g]) @ W1 + b1  ==  s @ W1_s + g @ W1_g + b1   (bf16 MXU dots, f32 acc)
    h1 = (jnp.dot(s_ref[...], w1s_ref[...], preferred_element_type=jnp.float32)
          + jnp.dot(g_ref[...], w1g_ref[...], preferred_element_type=jnp.float32)
          + b1_ref[...])
    h1 = jnp.maximum(h1, 0.0)

    # l2 + relu (f32)
    h2 = jnp.dot(h1, w2_ref[...], preferred_element_type=jnp.float32) + b2_ref[...]
    h2 = jnp.maximum(h2, 0.0)

    # l3 (no activation), output block [bm, 1]
    o_ref[...] = (jnp.dot(h2, w3_ref[...], preferred_element_type=jnp.float32)
                  + b3_ref[...]).astype(o_ref.dtype)


def _round_up(x, m):
    return (x + m - 1) // m * m


def potential_forward(s, g, params, *, block_rows=256):
    """s: [B, state_dim], g: [B, goal_dim] -> p: [B, 1] (float32)."""
    w1s, w1g, b1, w2, b2, w3, b3 = params
    B, state_dim = s.shape
    goal_dim = g.shape[1]
    hidden_dim = w2.shape[0]

    # bf16 streamed operands (halves HBM bytes of the dominant inputs).
    s_bf = s.astype(jnp.bfloat16)
    g_bf = g.astype(jnp.bfloat16)
    w1s_bf = w1s.astype(jnp.bfloat16)
    w1g_bf = w1g.astype(jnp.bfloat16)

    # Row tile: multiple of 16 (bf16 sublane packing); 256-aligned for large B.
    bm = min(block_rows, _round_up(B, 16))
    Bp = _round_up(B, bm)
    if Bp != B:
        pad = Bp - B
        s_bf = jnp.pad(s_bf, ((0, pad), (0, 0)))
        g_bf = jnp.pad(g_bf, ((0, pad), (0, 0)))

    grid = (Bp // bm,)

    def row_spec(cols):
        return pl.BlockSpec((bm, cols), lambda i: (i, 0))

    def resident_spec(a):
        # Full-array block, constant index -> stays resident in VMEM across steps.
        return pl.BlockSpec(a.shape, lambda i: (0, 0))

    in_dim = state_dim + goal_dim
    flops = 2 * Bp * (in_dim * hidden_dim + hidden_dim * hidden_dim + hidden_dim)
    bytes_accessed = (
        Bp * in_dim * 2                      # bf16 s + g
        + Bp * 1 * 4                         # f32 output
        + in_dim * hidden_dim * 2            # bf16 W1
        + (hidden_dim * hidden_dim + hidden_dim * 3 + hidden_dim + 1) * 4  # f32 W2/W3/biases
    )

    out = pl.pallas_call(
        potential_kernel,
        out_shape=jax.ShapeDtypeStruct((Bp, 1), jnp.float32),
        grid=grid,
        in_specs=[
            row_spec(state_dim),          # s tile
            row_spec(goal_dim),           # g tile
            resident_spec(w1s_bf),
            resident_spec(w1g_bf),
            resident_spec(b1),
            resident_spec(w2),
            resident_spec(b2),
            resident_spec(w3),
            resident_spec(b3),
        ],
        out_specs=pl.BlockSpec((bm, 1), lambda i: (i, 0)),
        compiler_params=pltpu.CompilerParams(
            dimension_semantics=("parallel",),     # megacore sharding on v7x
            vmem_limit_bytes=32 * 1024 * 1024,     # safe on v7x's 64 MiB VMEM
        ),
        cost_estimate=pl.CostEstimate(
            flops=flops, transcendentals=0, bytes_accessed=bytes_accessed),
    )(s_bf, g_bf, w1s_bf, w1g_bf, b1, w2, b2, w3, b3)

    return out[:B] if Bp != B else out


def init_params(key, state_dim, goal_dim, hidden_dim):
    """Deterministic synthetic init (PyTorch Linear-like uniform ranges)."""
    in_dim = state_dim + goal_dim
    ks = jax.random.split(key, 6)

    def lin(kw, kb, fan_in, fan_out):
        bound = 1.0 / jnp.sqrt(fan_in)
        w = jax.random.uniform(kw, (fan_in, fan_out), jnp.float32, -bound, bound)
        b = jax.random.uniform(kb, (1, fan_out), jnp.float32, -bound, bound)
        return w, b

    w1, b1 = lin(ks[0], ks[1], in_dim, hidden_dim)
    w2, b2 = lin(ks[2], ks[3], hidden_dim, hidden_dim)
    w3, b3 = lin(ks[4], ks[5], hidden_dim, 1)

    # split W1 along its input axis to match the folded concat
    w1s, w1g = w1[:state_dim], w1[state_dim:]
    return (w1s, w1g, b1, w2, b2, w3, b3), (w1, b1, w2, b2, w3, b3)


def reference_forward(s, g, raw_params, *, bf16_layer1=False):
    """Pure-JAX reference matching the PyTorch module.

    With bf16_layer1=True, s/g/W1 are rounded to bf16 (then f32 math) to match
    the kernel's layer-1 numerics exactly; layers 2/3 use full f32 (HIGHEST).
    """
    w1, b1, w2, b2, w3, b3 = raw_params
    hi = jax.lax.Precision.HIGHEST
    if bf16_layer1:
        s = s.astype(jnp.bfloat16).astype(jnp.float32)
        g = g.astype(jnp.bfloat16).astype(jnp.float32)
        w1 = w1.astype(jnp.bfloat16).astype(jnp.float32)
    x = jnp.concatenate([s, g], axis=-1)
    x = jnp.maximum(jnp.dot(x, w1, precision=hi) + b1, 0.0)
    x = jnp.maximum(jnp.dot(x, w2, precision=hi) + b2, 0.0)
    return jnp.dot(x, w3, precision=hi) + b3


if __name__ == "__main__":
    state_dim, goal_dim, hidden_dim = 12, 4, 32

    key = jax.random.PRNGKey(0)
    k_s, k_g, k_p, k_s2, k_g2 = jax.random.split(key, 5)
    params, raw_params = init_params(k_p, state_dim, goal_dim, hidden_dim)

    fwd = jax.jit(potential_forward)

    # Case 1: tiny batch (exercise the small-B padding-to-16 path).
    B = 8
    s = jax.random.normal(k_s, (B, state_dim), jnp.float32)
    g = jax.random.normal(k_g, (B, goal_dim), jnp.float32)
    p = jax.block_until_ready(fwd(s, g, params))
    assert p.shape == (B, 1)
    p_ref = reference_forward(s, g, raw_params, bf16_layer1=True)
    assert jnp.allclose(p, p_ref, atol=1e-3, rtol=1e-3)
    p_ref_f32 = reference_forward(s, g, raw_params)
    assert jnp.allclose(p, p_ref_f32, atol=5e-2, rtol=5e-2)

    # Case 2: multi-tile batch (grid > 1, non-divisible B -> padded tail).
    B2 = 300
    s2 = jax.random.normal(k_s2, (B2, state_dim), jnp.float32)
    g2 = jax.random.normal(k_g2, (B2, goal_dim), jnp.float32)
    p2 = jax.block_until_ready(fwd(s2, g2, params))
    assert p2.shape == (B2, 1)
    p2_ref = reference_forward(s2, g2, raw_params, bf16_layer1=True)
    assert jnp.allclose(p2, p2_ref, atol=1e-3, rtol=1e-3)

    print("KERNEL_OK")
</pallas_src>

<mosaic_0001>
module attributes {stable_mosaic.version = 11 : i64} {
  func.func @potential_kernel(%arg0: i32, %arg1: memref<16x12xbf16, #tpu.memory_space<vmem>>, %arg2: memref<16x4xbf16, #tpu.memory_space<vmem>>, %arg3: memref<12x32xbf16, #tpu.memory_space<vmem>>, %arg4: memref<4x32xbf16, #tpu.memory_space<vmem>>, %arg5: memref<1x32xf32, #tpu.memory_space<vmem>>, %arg6: memref<32x32xf32, #tpu.memory_space<vmem>>, %arg7: memref<1x32xf32, #tpu.memory_space<vmem>>, %arg8: memref<32x1xf32, #tpu.memory_space<vmem>>, %arg9: memref<1x1xf32, #tpu.memory_space<vmem>>, %arg10: memref<16x1xf32, #tpu.memory_space<vmem>>) attributes {dimension_semantics = [#tpu.dimension_semantics<parallel>], iteration_bounds = array<i64: 1>, scalar_prefetch = 0 : i64, scratch_operands = 0 : i64, tpu.core_type = #tpu.core_type<tc>, window_params = [{transform_indices = @transform_0, window_bounds = array<i64: 16, 12>}, {transform_indices = @transform_1, window_bounds = array<i64: 16, 4>}, {pipeline_mode = #tpu.pipeline_mode<synchronous>, transform_indices = @transform_2, window_bounds = array<i64: 12, 32>}, {pipeline_mode = #tpu.pipeline_mode<synchronous>, transform_indices = @transform_3, window_bounds = array<i64: 4, 32>}, {pipeline_mode = #tpu.pipeline_mode<synchronous>, transform_indices = @transform_4, window_bounds = array<i64: 1, 32>}, {pipeline_mode = #tpu.pipeline_mode<synchronous>, transform_indices = @transform_5, window_bounds = array<i64: 32, 32>}, {pipeline_mode = #tpu.pipeline_mode<synchronous>, transform_indices = @transform_6, window_bounds = array<i64: 1, 32>}, {pipeline_mode = #tpu.pipeline_mode<synchronous>, transform_indices = @transform_7, window_bounds = array<i64: 32, 1>}, {pipeline_mode = #tpu.pipeline_mode<synchronous>, transform_indices = @transform_8, window_bounds = array<i64: 1, 1>}, {transform_indices = @transform_9, window_bounds = array<i64: 16, 1>}]} {
    %c0 = arith.constant 0 : index
    %c0_0 = arith.constant 0 : index
    %0 = vector.load %arg1[%c0, %c0_0] : memref<16x12xbf16, #tpu.memory_space<vmem>>, vector<16x12xbf16>
    %c0_1 = arith.constant 0 : index
    %c0_2 = arith.constant 0 : index
    %1 = vector.load %arg3[%c0_1, %c0_2] : memref<12x32xbf16, #tpu.memory_space<vmem>>, vector<12x32xbf16>
    %cst = arith.constant dense<0.000000e+00> : vector<16x32xf32>
    %2 = tpu.matmul %0, %1, %cst {dimension_numbers = #tpu.dot_dimension_numbers<[1], [0], [0], [1], [0, 0, 1, 1], [], []>} : vector<16x12xbf16>, vector<12x32xbf16>, vector<16x32xf32> -> vector<16x32xf32>
    %c0_3 = arith.constant 0 : index
    %c0_4 = arith.constant 0 : index
    %3 = vector.load %arg2[%c0_3, %c0_4] : memref<16x4xbf16, #tpu.memory_space<vmem>>, vector<16x4xbf16>
    %c0_5 = arith.constant 0 : index
    %c0_6 = arith.constant 0 : index
    %4 = vector.load %arg4[%c0_5, %c0_6] : memref<4x32xbf16, #tpu.memory_space<vmem>>, vector<4x32xbf16>
    %cst_7 = arith.constant dense<0.000000e+00> : vector<16x32xf32>
    %5 = tpu.matmul %3, %4, %cst_7 {dimension_numbers = #tpu.dot_dimension_numbers<[1], [0], [0], [1], [0, 0, 1, 1], [], []>} : vector<16x4xbf16>, vector<4x32xbf16>, vector<16x32xf32> -> vector<16x32xf32>
    %6 = arith.addf %2, %5 : vector<16x32xf32>
    %c0_8 = arith.constant 0 : index
    %c0_9 = arith.constant 0 : index
    %7 = vector.load %arg5[%c0_8, %c0_9] : memref<1x32xf32, #tpu.memory_space<vmem>>, vector<1x32xf32>
    %8 = vector.broadcast %7 : vector<1x32xf32> to vector<16x32xf32>
    %9 = arith.addf %6, %8 : vector<16x32xf32>
    %cst_10 = arith.constant 0.000000e+00 : f32
    %10 = vector.broadcast %cst_10 : f32 to vector<16x32xf32>
    %11 = arith.maximumf %9, %10 : vector<16x32xf32>
    %c0_11 = arith.constant 0 : index
    %c0_12 = arith.constant 0 : index
    %12 = vector.load %arg6[%c0_11, %c0_12] : memref<32x32xf32, #tpu.memory_space<vmem>>, vector<32x32xf32>
    %cst_13 = arith.constant dense<0.000000e+00> : vector<16x32xf32>
    %13 = tpu.matmul %11, %12, %cst_13 {dimension_numbers = #tpu.dot_dimension_numbers<[1], [0], [0], [1], [0, 0, 1, 1], [], []>} : vector<16x32xf32>, vector<32x32xf32>, vector<16x32xf32> -> vector<16x32xf32>
    %c0_14 = arith.constant 0 : index
    %c0_15 = arith.constant 0 : index
    %14 = vector.load %arg7[%c0_14, %c0_15] : memref<1x32xf32, #tpu.memory_space<vmem>>, vector<1x32xf32>
    %15 = vector.broadcast %14 : vector<1x32xf32> to vector<16x32xf32>
    %16 = arith.addf %13, %15 : vector<16x32xf32>
    %cst_16 = arith.constant 0.000000e+00 : f32
    %17 = vector.broadcast %cst_16 : f32 to vector<16x32xf32>
    %18 = arith.maximumf %16, %17 : vector<16x32xf32>
    %c0_17 = arith.constant 0 : index
    %c0_18 = arith.constant 0 : index
    %19 = vector.load %arg8[%c0_17, %c0_18] : memref<32x1xf32, #tpu.memory_space<vmem>>, vector<32x1xf32>
    %cst_19 = arith.constant dense<0.000000e+00> : vector<16x1xf32>
    %20 = tpu.matmul %18, %19, %cst_19 {dimension_numbers = #tpu.dot_dimension_numbers<[1], [0], [0], [1], [0, 0, 1, 1], [], []>} : vector<16x32xf32>, vector<32x1xf32>, vector<16x1xf32> -> vector<16x1xf32>
    %c0_20 = arith.constant 0 : index
    %c0_21 = arith.constant 0 : index
    %21 = vector.load %arg9[%c0_20, %c0_21] : memref<1x1xf32, #tpu.memory_space<vmem>>, vector<1x1xf32>
    %22 = vector.broadcast %21 : vector<1x1xf32> to vector<16x1xf32>
    %23 = arith.addf %20, %22 : vector<16x1xf32>
    %c0_22 = arith.constant 0 : index
    %c0_23 = arith.constant 0 : index
    %24 = vector.load %arg10[%c0_22, %c0_23] : memref<16x1xf32, #tpu.memory_space<vmem>>, vector<16x1xf32>
    tpu.vector_store %arg10[%c0_22, %c0_23], %23 {strides = array<i32>} : memref<16x1xf32, #tpu.memory_space<vmem>>, vector<16x1xf32>,
    return
  }
  func.func @transform_0(%arg0: i32) -> (i32, i32) {
    %c0_i32 = arith.constant 0 : i32
    %c0_i32_0 = arith.constant 0 : i32
    return %arg0, %c0_i32 : i32, i32
  }
  func.func @transform_1(%arg0: i32) -> (i32, i32) {
    %c0_i32 = arith.constant 0 : i32
    %c0_i32_0 = arith.constant 0 : i32
    return %arg0, %c0_i32 : i32, i32
  }
  func.func @transform_2(%arg0: i32) -> (i32, i32) {
    %c0_i32 = arith.constant 0 : i32
    %c0_i32_0 = arith.constant 0 : i32
    %c0_i32_1 = arith.constant 0 : i32
    return %c0_i32, %c0_i32_0 : i32, i32
  }
  func.func @transform_3(%arg0: i32) -> (i32, i32) {
    %c0_i32 = arith.constant 0 : i32
    %c0_i32_0 = arith.constant 0 : i32
    %c0_i32_1 = arith.constant 0 : i32
    return %c0_i32, %c0_i32_0 : i32, i32
  }
  func.func @transform_4(%arg0: i32) -> (i32, i32) {
    %c0_i32 = arith.constant 0 : i32
    %c0_i32_0 = arith.constant 0 : i32
    %c0_i32_1 = arith.constant 0 : i32
    return %c0_i32, %c0_i32_0 : i32, i32
  }
  func.func @transform_5(%arg0: i32) -> (i32, i32) {
    %c0_i32 = arith.constant 0 : i32
    %c0_i32_0 = arith.constant 0 : i32
    %c0_i32_1 = arith.constant 0 : i32
    return %c0_i32, %c0_i32_0 : i32, i32
  }
  func.func @transform_6(%arg0: i32) -> (i32, i32) {
    %c0_i32 = arith.constant 0 : i32
    %c0_i32_0 = arith.constant 0 : i32
    %c0_i32_1 = arith.constant 0 : i32
    return %c0_i32, %c0_i32_0 : i32, i32
  }
  func.func @transform_7(%arg0: i32) -> (i32, i32) {
    %c0_i32 = arith.constant 0 : i32
    %c0_i32_0 = arith.constant 0 : i32
    %c0_i32_1 = arith.constant 0 : i32
    return %c0_i32, %c0_i32_0 : i32, i32
  }
  func.func @transform_8(%arg0: i32) -> (i32, i32) {
    %c0_i32 = arith.constant 0 : i32
    %c0_i32_0 = arith.constant 0 : i32
    %c0_i32_1 = arith.constant 0 : i32
    return %c0_i32, %c0_i32_0 : i32, i32
  }
  func.func @transform_9(%arg0: i32) -> (i32, i32) {
    %c0_i32 = arith.constant 0 : i32
    %c0_i32_0 = arith.constant 0 : i32
    return %arg0, %c0_i32 : i32, i32
  }
}

</mosaic_0001>

<bundles_post_ra>
// kernel: potential_forward.1
= control target key start
LH: loop header
LB: loop body
LE: loop exit
PB: predicated region body
PF: predicated region fallthrough
CT: control target
= control target key end

     0   :  { %vm51_vm0 = vcmask 1041408   ;;  %vm110_vm1 = vcmask 1045504   ;;  %v443_v0 = vmov 0.0   ;;  %vm444_vm2 = vmmov 0   ;;  %s550_s3 = inlined_call_operand.vmem [shape: bf16[4,32], index: 3, kind: input, shape index: {}]   ;;  %s551_s2 = inlined_call_operand.vmem [shape: bf16[12,32], index: 2, kind: input, shape index: {}]   ;;  %s552_s1 = inlined_call_operand.vmem [shape: bf16[16,4], index: 1, kind: input, shape index: {}]   ;;  %s553_s0 = inlined_call_operand.vmem [shape: bf16[16,12], index: 0, kind: input, shape index: {}]   ;;  %s554_s5 = inlined_call_operand.vmem [shape: f32[32,32], index: 5, kind: input, shape index: {}]   ;;  %s555_s7 = inlined_call_operand.vmem [shape: f32[32,1], index: 7, kind: input, shape index: {}]   ;;  %s556_s4 = inlined_call_operand.vmem [shape: f32[1,32], index: 4, kind: input, shape index: {}]   ;;  %s557_s8 = inlined_call_operand.<no memory space> [shape: f32[1,1], index: 8, kind: input, shape index: {}]   ;;  %s558_s6 = inlined_call_operand.vmem [shape: f32[1,32], index: 6, kind: input, shape index: {}]   ;;  %s559_s9 = inlined_call_operand.vmem [shape: f32[16,1], index: 9, kind: output, shape index: {}]  }
   0x1   :  { %388 = vmatprep.subr.bf16.mxu0 %v443_v0  ;;  %v41_v1 = vld [vmem:[%s550_s3] sm:$0x3]  ;;  %394 = vmatprep.subr.bf16.mxu1 %v443_v0  ;;  %vm47_vm3 = vcmask 31744   ;;  %vm106_vm4 = vcmask 97280   ;;  %v167_v8 = vld [vmem:[%s554_s5 + $0x8] sm:$0xff]  ;;  %v168_v10 = vld [vmem:[%s554_s5 + $0x10] sm:$0xff]  ;;  %v14_v34 = vstv %s557_s8 }
   0x2   :  { %v53_v2 = vsel %vm51_vm0, %v41_v1, 0  ;;  %390 = vmatprep.mubr.msk.bf16.mxu0 %vm444_vm2, %v443_v0  ;;  %v440_v3 = vld [vmem:[%s551_s2] sm:$0x3f]   ;;  %396 = vmatprep.mubr.msk.bf16.mxu1 %vm444_vm2, %v443_v0  ;;  %v169_v11 = vld [vmem:[%s554_s5 + $0x18] sm:$0xff]  ;;  %v262_v14 = vld [vmem:[%s555_s7 + $0x8] sm:$0xff]  ;;  %vm177_vm5 = vcmask 261120  }
   0x3   :  { %v441_v4 = vld [vmem:[%s552_s1] sm:$0xff]   ;;  %389 = vmatpush3.bf16.msra.mxu0 %v53_v2  ;;  %v112_v5 = vsel %vm110_vm1, %v440_v3, 0  ;;  %v426_v12 = vpack.c.bf16 %v169_v11, %v168_v10  ;;  %v263_v31 = vld [vmem:[%s555_s7 + $0x10] sm:$0xff]  ;;  %v264_v32 = vld [vmem:[%s555_s7 + $0x18] sm:$0xff]  ;;  %15 = vst [vmem:[#allocation2] sm:$0x1] %v14_v34 }
   0x4   :  { %v442_v6 = vld [vmem:[%s553_s0] sm:$0xff]   ;;  %395 = vmatpush3.bf16.msra.mxu1 %v112_v5  ;;  %v434_v33 = vpack.c.bf16 %v264_v32, %v263_v31  ;;  %vm353_vm6 = vcmask 7168  }
   0x5   :  { %v166_v7 = vld [vmem:[%s554_s5] sm:$0xff] }
   0x6   :  { %391 = vmatmul.mubr.msk.bf16.vlgmr.msra.gmra.mrb[0].mxu0 %vm47_vm3, %v441_v4  ;;  %v422_v9 = vpack.c.bf16 %v167_v8, %v166_v7  ;;  %v261_v13 = vld [vmem:[%s555_s7] sm:$0xff] }
   0x7   :  { %397 = vmatmul.mubr.msk.bf16.vlgmr.msra.gmra.mrb[0].mxu1 %vm106_vm4, %v442_v6  ;;  %v430_v15 = vpack.c.bf16 %v262_v14, %v261_v13  ;;  %v365_v20 = vld [vmem:[%s556_s4] ss:$0 sm:$0xff] }
   0x8   :  { %423 = vmatprep.subr.bf16.mxu0 %v422_v9  ;;  %v366_v35 = vld [vmem:[%s558_s6] ss:$0 sm:$0xff] }
   0x9   :  { %425 = vmatpush3.bf16.msra.mxu0 %v422_v9  ;;  %431 = vmatprep.subr.bf16.mxu1 %v430_v15 }
   0xa   :  { %427 = vmatprep.subr.bf16.mxu0 %v426_v12  ;;  %433 = vmatpush3.bf16.msra.mxu1 %v430_v15  ;;  %v369_v42 = vld [vmem:[#allocation2] ss:$0 sm:$0xff] }
   0xb   :  { %435 = vmatprep.subr.bf16.mxu1 %v434_v33 }
   0xd   :  { %429 = vmatpush3.bf16.msra.mxu0 %v426_v12 }
   0xe   :  { %437 = vmatpush3.bf16.msra.mxu1 %v434_v33 }
  0xd9   :  { %v89_v16 = vpop.f32.mrb[0].mxu0 }
  0xda   :  { %v392_v17 = vpop.f32.mrb[1].mxu0  ;;  %v148_v19 = vpop.f32.mrb[0].mxu1 }
  0xdb   :  { %v92_v18 = vpop.f32.mrb[2].mxu0  ;;  %v149_v21 = vadd.f32 %v148_v19, %v89_v16  ;;  %v398_v23 = vpop.f32.mrb[1].mxu1 }
  0xdc   :  { %v393_v22 = vpop.f32.mrb[3].mxu0  ;;  %v151_v24 = vpop.f32.mrb[2].mxu1 }
  0xdd   :  { %v162_v25 = vadd.f32 %v365_v20, %v149_v21  ;;  %v152_v26 = vadd.f32 %v151_v24, %v92_v18  ;;  %v399_v27 = vpop.f32.mrb[3].mxu1 }
  0xdf   :  { %v164_v28 = vmax.f32 %v162_v25, 0.0  ;;  %v163_v29 = vadd.f32 %v365_v20, %v152_v26 }
  0xe1   :  { %v165_v30 = vmax.f32 %v163_v29, 0.0  ;;  %408 = vmatprep.mubr.msk.f32.mxu0 %vm177_vm5, %v164_v28 }
  0xe3   :  { %409 = vmatmul.mubr.msk.f32.vlgmr.msra.gmra.mrb[4].mxu0 %vm177_vm5, %v165_v30 }
 0x1b6   :  { %v410_v36 = vpop.f32.mrb[4].mxu0 }
 0x1b7   :  { %v256_v37 = vadd.f32 %v410_v36, %v366_v35  ;;  %v250_v38 = vpop.f32.mrb[5].mxu0 }
 0x1b8   :  { %v251_v39 = vadd.f32 %v366_v35, %v250_v38 }
 0x1b9   :  { %v260_v41 = vmax.f32 %v256_v37, 0.0 }
 0x1ba   :  { %v259_v40 = vmax.f32 %v251_v39, 0.0 }
 0x1bc   :  { %419 = vmatprep.mubr.msk.f32.mxu1 %vm177_vm5, %v259_v40 }
 0x1bd   :  { %420 = vmatmul.mubr.msk.f32.vlgmr.msra.gmra.mrb[4].mxu1 %vm177_vm5, %v260_v41 }
 0x290   :  { %v421_v43 = vpop.f32.mrb[4].mxu1 }
 0x291   :  { %v350_v44 = vadd.f32 %v421_v43, %v369_v42  ;;  %v344_v45 = vpop.f32.mrb[5].mxu1 }
 0x292   :  { %v345_v46 = vadd.f32 %v369_v42, %v344_v45 }
 0x293   :  { %355 = vst.msk [vmem:[%s559_s9 + $0x8] sm:$0xff] %vm353_vm6, %v350_v44 }
 0x294   :  { %354 = vst.msk [vmem:[%s559_s9] sm:$0xff] %vm353_vm6, %v345_v46 }

</bundles_post_ra>
